<compile_context>
chip_gen: v7x
topology: tpu7x:2x2x1
jax: 0.10.0
libtpu: 0.0.40
codegen_flags: <defaults>
</compile_context>

<pallas_src>
import functools

import jax
import jax.numpy as jnp
import numpy as np
from jax.experimental import pallas as pl
from jax.experimental.pallas import tpu as pltpu

# ----- problem sizes (MountainCarContinuous-v0) -----
N_STATES = 2
N_ACTIONS = 1
MAX_ACTION = 1.0  # env.action_space.high[0]

H1 = 400
H2 = 300


def _round_up(x, m):
    return ((x + m - 1) // m) * m


# ----- padded sizes -----
H1_P = _round_up(H1, 128)            # 512
H2_P = _round_up(H2, 128)            # 384
D_OUT_P = _round_up(N_ACTIONS, 8)    # 8  (full-array last dim is allowed)

TB_MAX = 1024                        # max batch tile (amortize grid-step overhead)


def actor_kernel(x_ref, w1_ref, b1_ref, w2_ref, b2_ref, w3_ref, b3_ref,
                 o_ref, *, max_action):
    """fc1 on the VPU (K==2), fc2/fc3 on the MXU (bf16 in, f32 acc)."""
    # --- fc1: real K is n_states=2, so an MXU pass would be ~6% utilized.
    #     Two lane-broadcast FMAs over [TB, H1_P] in f32 instead.
    x = x_ref[...]                       # (TB, n_states) f32
    w1 = w1_ref[...]                     # (n_states, H1_P) f32
    h1 = x[:, 0:1] * w1[0:1, :]
    for k in range(1, x.shape[1]):       # unrolled at trace time (n_states=2)
        h1 = h1 + x[:, k:k + 1] * w1[k:k + 1, :]
    h1 = jnp.maximum(h1 + b1_ref[...], 0.0)

    # --- fc2 / fc3: MXU matmuls, bf16 operands, f32 accumulation.
    h2 = jnp.dot(h1.astype(jnp.bfloat16), w2_ref[...],
                 preferred_element_type=jnp.float32) + b2_ref[...]
    h2 = jnp.maximum(h2, 0.0)
    y = jnp.dot(h2.astype(jnp.bfloat16), w3_ref[...],
                preferred_element_type=jnp.float32) + b3_ref[...]
    o_ref[...] = (jnp.tanh(y) * max_action).astype(o_ref.dtype)


def init_actor_params(key, n_states=N_STATES, n_actions=N_ACTIONS):
    """kaiming_normal_ weights (fan_in, relu gain), bias = 0.001.

    Returned in (in, out) layout, f32, unpadded.
    """
    k1, k2, k3 = jax.random.split(key, 3)

    def kaiming(k, fan_in, fan_out):
        std = np.sqrt(2.0 / fan_in)
        w = jax.random.normal(k, (fan_out, fan_in), dtype=jnp.float32) * std
        return w.T  # (in, out)

    return {
        "w1": kaiming(k1, n_states, H1), "b1": jnp.full((H1,), 0.001, jnp.float32),
        "w2": kaiming(k2, H1, H2),       "b2": jnp.full((H2,), 0.001, jnp.float32),
        "w3": kaiming(k3, H2, n_actions),"b3": jnp.full((n_actions,), 0.001, jnp.float32),
    }


def _pad2(a, rows, cols):
    return jnp.pad(a, ((0, rows - a.shape[0]), (0, cols - a.shape[1])))


def prepare_actor_params(params):
    """One-time prep: zero-pad to kernel shapes; w2/w3 cast to bf16.

    Call once after (re)loading/updating parameters; the jitted forward
    consumes these pre-padded arrays directly (no per-call padding ops).
    w1 stays f32 (it feeds the VPU fc1 path, only ~4 KiB).
    """
    return {
        "w1": _pad2(params["w1"], N_STATES, H1_P),                    # f32
        "w2": _pad2(params["w2"], H1_P, H2_P).astype(jnp.bfloat16),
        "w3": _pad2(params["w3"], H2_P, D_OUT_P).astype(jnp.bfloat16),
        "b1": _pad2(params["b1"][None, :], 1, H1_P),
        "b2": _pad2(params["b2"][None, :], 1, H2_P),
        "b3": _pad2(params["b3"][None, :], 1, D_OUT_P),
    }


def _choose_tiling(B):
    """Return (padded batch B_P, batch tile TB, num blocks) minimizing pad rows.

    Small (act-path) batches: single block, 16-row granularity.
    Replay-sized batches: 128-row granularity and >= 2 parallel blocks so the
    batch axis shards across both v7x TensorCores; tiles capped at TB_MAX.
    """
    if B <= 128:
        bp = _round_up(max(B, 16), 16)
        return bp, bp, 1
    bp = _round_up(B, 128)
    nb = max(2, (bp + TB_MAX - 1) // TB_MAX)
    while bp % (nb * 128) != 0:          # TB must be a 128-multiple dividing bp
        nb += 1
    return bp, bp // nb, nb


@functools.partial(jax.jit, static_argnames=("max_action",))
def actor_forward(x, padded_params, max_action=MAX_ACTION):
    """x: (batch, n_states) f32 -> (batch, n_actions) f32."""
    B = x.shape[0]
    B_P, TB, nb = _choose_tiling(B)

    # Per-call prep is only a row pad of the tiny activation (stays f32).
    x_p = jnp.pad(x, ((0, B_P - B), (0, 0)))

    p = padded_params
    const = lambda shape: pl.BlockSpec(shape, lambda i: (0, 0))

    out = pl.pallas_call(
        functools.partial(actor_kernel, max_action=float(max_action)),
        out_shape=jax.ShapeDtypeStruct((B_P, D_OUT_P), jnp.float32),
        grid=(nb,),
        in_specs=[
            pl.BlockSpec((TB, N_STATES), lambda i: (i, 0)),   # x: tiled over batch
            const((N_STATES, H1_P)), const((1, H1_P)),        # w1, b1 (resident)
            const((H1_P, H2_P)),     const((1, H2_P)),        # w2, b2
            const((H2_P, D_OUT_P)),  const((1, D_OUT_P)),     # w3, b3
        ],
        out_specs=pl.BlockSpec((TB, D_OUT_P), lambda i: (i, 0)),
        compiler_params=pltpu.CompilerParams(
            dimension_semantics=("parallel",)),
    )(x_p, p["w1"], p["b1"], p["w2"], p["b2"], p["w3"], p["b3"])

    return out[:B, :N_ACTIONS]


def actor_forward_ref(x, params, max_action=MAX_ACTION):
    """Pure f32 JAX reference (matches the PyTorch module)."""
    h1 = jnp.maximum(x @ params["w1"] + params["b1"], 0.0)
    h2 = jnp.maximum(h1 @ params["w2"] + params["b2"], 0.0)
    return jnp.tanh(h2 @ params["w3"] + params["b3"]) * max_action


if __name__ == "__main__":
    key = jax.random.PRNGKey(0)
    pkey, xkey1, xkey2 = jax.random.split(key, 3)

    params = init_actor_params(pkey)
    padded_params = prepare_actor_params(params)   # one-time prep, off the hot path

    # Act-path sized batch.
    x_small = jax.random.normal(xkey1, (2, N_STATES), dtype=jnp.float32)
    y_small = actor_forward(x_small, padded_params)
    jax.block_until_ready(y_small)
    np.testing.assert_allclose(np.asarray(y_small),
                               np.asarray(actor_forward_ref(x_small, params)),
                               rtol=2e-2, atol=2e-2)
    assert y_small.shape == (2, N_ACTIONS)

    # Replay-sized, awkward batch: exercises the multi-block parallel path
    # (B=272 -> B_P=384, TB=128, 3 blocks -> minimal pad, both v7x TCs busy).
    x_big = jax.random.normal(xkey2, (272, N_STATES), dtype=jnp.float32)
    y_big = actor_forward(x_big, padded_params)
    jax.block_until_ready(y_big)
    np.testing.assert_allclose(np.asarray(y_big),
                               np.asarray(actor_forward_ref(x_big, params)),
                               rtol=2e-2, atol=2e-2)
    assert y_big.shape == (272, N_ACTIONS)

    print("KERNEL_OK")
</pallas_src>

<mosaic_0001>
module attributes {stable_mosaic.version = 11 : i64} {
  func.func @actor_kernel(%arg0: i32, %arg1: memref<16x2xf32, #tpu.memory_space<vmem>>, %arg2: memref<2x512xf32, #tpu.memory_space<vmem>>, %arg3: memref<1x512xf32, #tpu.memory_space<vmem>>, %arg4: memref<512x384xbf16, #tpu.memory_space<vmem>>, %arg5: memref<1x384xf32, #tpu.memory_space<vmem>>, %arg6: memref<384x8xbf16, #tpu.memory_space<vmem>>, %arg7: memref<1x8xf32, #tpu.memory_space<vmem>>, %arg8: memref<16x8xf32, #tpu.memory_space<vmem>>) attributes {dimension_semantics = [#tpu.dimension_semantics<parallel>], iteration_bounds = array<i64: 1>, scalar_prefetch = 0 : i64, scratch_operands = 0 : i64, tpu.core_type = #tpu.core_type<tc>, window_params = [{transform_indices = @transform_0, window_bounds = array<i64: 16, 2>}, {pipeline_mode = #tpu.pipeline_mode<synchronous>, transform_indices = @transform_1, window_bounds = array<i64: 2, 512>}, {pipeline_mode = #tpu.pipeline_mode<synchronous>, transform_indices = @transform_2, window_bounds = array<i64: 1, 512>}, {pipeline_mode = #tpu.pipeline_mode<synchronous>, transform_indices = @transform_3, window_bounds = array<i64: 512, 384>}, {pipeline_mode = #tpu.pipeline_mode<synchronous>, transform_indices = @transform_4, window_bounds = array<i64: 1, 384>}, {pipeline_mode = #tpu.pipeline_mode<synchronous>, transform_indices = @transform_5, window_bounds = array<i64: 384, 8>}, {pipeline_mode = #tpu.pipeline_mode<synchronous>, transform_indices = @transform_6, window_bounds = array<i64: 1, 8>}, {transform_indices = @transform_7, window_bounds = array<i64: 16, 8>}]} {
    %c0 = arith.constant 0 : index
    %c0_0 = arith.constant 0 : index
    %0 = vector.load %arg1[%c0, %c0_0] : memref<16x2xf32, #tpu.memory_space<vmem>>, vector<16x2xf32>
    %c0_1 = arith.constant 0 : index
    %c0_2 = arith.constant 0 : index
    %1 = vector.load %arg2[%c0_1, %c0_2] : memref<2x512xf32, #tpu.memory_space<vmem>>, vector<2x512xf32>
    %2 = vector.extract_strided_slice %0 {offsets = [0, 0], sizes = [16, 1], strides = [1, 1]} : vector<16x2xf32> to vector<16x1xf32>
    %3 = vector.extract_strided_slice %1 {offsets = [0, 0], sizes = [1, 512], strides = [1, 1]} : vector<2x512xf32> to vector<1x512xf32>
    %4 = vector.broadcast %2 : vector<16x1xf32> to vector<16x512xf32>
    %5 = vector.broadcast %3 : vector<1x512xf32> to vector<16x512xf32>
    %6 = arith.mulf %4, %5 : vector<16x512xf32>
    %7 = vector.extract_strided_slice %0 {offsets = [0, 1], sizes = [16, 1], strides = [1, 1]} : vector<16x2xf32> to vector<16x1xf32>
    %8 = vector.extract_strided_slice %1 {offsets = [1, 0], sizes = [1, 512], strides = [1, 1]} : vector<2x512xf32> to vector<1x512xf32>
    %9 = vector.broadcast %7 : vector<16x1xf32> to vector<16x512xf32>
    %10 = vector.broadcast %8 : vector<1x512xf32> to vector<16x512xf32>
    %11 = arith.mulf %9, %10 : vector<16x512xf32>
    %12 = arith.addf %6, %11 : vector<16x512xf32>
    %c0_3 = arith.constant 0 : index
    %c0_4 = arith.constant 0 : index
    %13 = vector.load %arg3[%c0_3, %c0_4] : memref<1x512xf32, #tpu.memory_space<vmem>>, vector<1x512xf32>
    %14 = vector.broadcast %13 : vector<1x512xf32> to vector<16x512xf32>
    %15 = arith.addf %12, %14 : vector<16x512xf32>
    %cst = arith.constant 0.000000e+00 : f32
    %16 = vector.broadcast %cst : f32 to vector<16x512xf32>
    %17 = arith.maximumf %15, %16 : vector<16x512xf32>
    %18 = arith.truncf %17 : vector<16x512xf32> to vector<16x512xbf16>
    %c0_5 = arith.constant 0 : index
    %c0_6 = arith.constant 0 : index
    %19 = vector.load %arg4[%c0_5, %c0_6] : memref<512x384xbf16, #tpu.memory_space<vmem>>, vector<512x384xbf16>
    %cst_7 = arith.constant dense<0.000000e+00> : vector<16x384xf32>
    %20 = tpu.matmul %18, %19, %cst_7 {dimension_numbers = #tpu.dot_dimension_numbers<[1], [0], [0], [1], [0, 0, 1, 1], [], []>} : vector<16x512xbf16>, vector<512x384xbf16>, vector<16x384xf32> -> vector<16x384xf32>
    %c0_8 = arith.constant 0 : index
    %c0_9 = arith.constant 0 : index
    %21 = vector.load %arg5[%c0_8, %c0_9] : memref<1x384xf32, #tpu.memory_space<vmem>>, vector<1x384xf32>
    %22 = vector.broadcast %21 : vector<1x384xf32> to vector<16x384xf32>
    %23 = arith.addf %20, %22 : vector<16x384xf32>
    %cst_10 = arith.constant 0.000000e+00 : f32
    %24 = vector.broadcast %cst_10 : f32 to vector<16x384xf32>
    %25 = arith.maximumf %23, %24 : vector<16x384xf32>
    %26 = arith.truncf %25 : vector<16x384xf32> to vector<16x384xbf16>
    %c0_11 = arith.constant 0 : index
    %c0_12 = arith.constant 0 : index
    %27 = vector.load %arg6[%c0_11, %c0_12] : memref<384x8xbf16, #tpu.memory_space<vmem>>, vector<384x8xbf16>
    %cst_13 = arith.constant dense<0.000000e+00> : vector<16x8xf32>
    %28 = tpu.matmul %26, %27, %cst_13 {dimension_numbers = #tpu.dot_dimension_numbers<[1], [0], [0], [1], [0, 0, 1, 1], [], []>} : vector<16x384xbf16>, vector<384x8xbf16>, vector<16x8xf32> -> vector<16x8xf32>
    %c0_14 = arith.constant 0 : index
    %c0_15 = arith.constant 0 : index
    %29 = vector.load %arg7[%c0_14, %c0_15] : memref<1x8xf32, #tpu.memory_space<vmem>>, vector<1x8xf32>
    %30 = vector.broadcast %29 : vector<1x8xf32> to vector<16x8xf32>
    %31 = arith.addf %28, %30 : vector<16x8xf32>
    %32 = math.tanh %31 : vector<16x8xf32>
    %cst_16 = arith.constant 1.000000e+00 : f32
    %33 = vector.broadcast %cst_16 : f32 to vector<16x8xf32>
    %34 = arith.mulf %32, %33 : vector<16x8xf32>
    %c0_17 = arith.constant 0 : index
    %c0_18 = arith.constant 0 : index
    %35 = vector.load %arg8[%c0_17, %c0_18] : memref<16x8xf32, #tpu.memory_space<vmem>>, vector<16x8xf32>
    tpu.vector_store %arg8[%c0_17, %c0_18], %34 {strides = array<i32>} : memref<16x8xf32, #tpu.memory_space<vmem>>, vector<16x8xf32>,
    return
  }
  func.func @transform_0(%arg0: i32) -> (i32, i32) {
    %c0_i32 = arith.constant 0 : i32
    %c0_i32_0 = arith.constant 0 : i32
    return %arg0, %c0_i32 : i32, i32
  }
  func.func @transform_1(%arg0: i32) -> (i32, i32) {
    %c0_i32 = arith.constant 0 : i32
    %c0_i32_0 = arith.constant 0 : i32
    %c0_i32_1 = arith.constant 0 : i32
    return %c0_i32, %c0_i32_0 : i32, i32
  }
  func.func @transform_2(%arg0: i32) -> (i32, i32) {
    %c0_i32 = arith.constant 0 : i32
    %c0_i32_0 = arith.constant 0 : i32
    %c0_i32_1 = arith.constant 0 : i32
    return %c0_i32, %c0_i32_0 : i32, i32
  }
  func.func @transform_3(%arg0: i32) -> (i32, i32) {
    %c0_i32 = arith.constant 0 : i32
    %c0_i32_0 = arith.constant 0 : i32
    %c0_i32_1 = arith.constant 0 : i32
    return %c0_i32, %c0_i32_0 : i32, i32
  }
  func.func @transform_4(%arg0: i32) -> (i32, i32) {
    %c0_i32 = arith.constant 0 : i32
    %c0_i32_0 = arith.constant 0 : i32
    %c0_i32_1 = arith.constant 0 : i32
    return %c0_i32, %c0_i32_0 : i32, i32
  }
  func.func @transform_5(%arg0: i32) -> (i32, i32) {
    %c0_i32 = arith.constant 0 : i32
    %c0_i32_0 = arith.constant 0 : i32
    %c0_i32_1 = arith.constant 0 : i32
    return %c0_i32, %c0_i32_0 : i32, i32
  }
  func.func @transform_6(%arg0: i32) -> (i32, i32) {
    %c0_i32 = arith.constant 0 : i32
    %c0_i32_0 = arith.constant 0 : i32
    %c0_i32_1 = arith.constant 0 : i32
    return %c0_i32, %c0_i32_0 : i32, i32
  }
  func.func @transform_7(%arg0: i32) -> (i32, i32) {
    %c0_i32 = arith.constant 0 : i32
    %c0_i32_0 = arith.constant 0 : i32
    return %arg0, %c0_i32 : i32, i32
  }
}

</mosaic_0001>

<bundles_post_ra>
// kernel: actor_forward.1
= control target key start
LH: loop header
LB: loop body
LE: loop exit
PB: predicated region body
PF: predicated region fallthrough
CT: control target
= control target key end

     0   :  { %12 = vsyncpa [#allocation3], 0  ;;  %s1740_s24 = smov [#allocation2]   ;;  %s1977_s0 = inlined_call_operand.vmem [shape: f32[16,2], index: 0, kind: input, shape index: {}]   ;;  %s1978_s1 = inlined_call_operand.vmem [shape: f32[2,512], index: 1, kind: input, shape index: {}]   ;;  %s1979_s2 = inlined_call_operand.vmem [shape: f32[1,512], index: 2, kind: input, shape index: {}]   ;;  %s1980_s3 = inlined_call_operand.hbm [shape: bf16[512,384], index: 3, kind: input, shape index: {}]   ;;  %s1981_s4 = inlined_call_operand.vmem [shape: f32[1,384], index: 4, kind: input, shape index: {}]   ;;  %s1982_s5 = inlined_call_operand.vmem [shape: bf16[384,8], index: 5, kind: input, shape index: {}]   ;;  %s1983_s6 = inlined_call_operand.vmem [shape: f32[1,8], index: 6, kind: input, shape index: {}]   ;;  %s1984_s7 = inlined_call_operand.vmem [shape: f32[16,8], index: 7, kind: output, shape index: {}]  }
   0x1   :  { %s24_s25 = sshll.u32 %s1740_s24, 4  ;;  %s1716_s28 = scalar_lea.hbm %s1980_s3, 12288  ;;  %s25_s25 = int_to_ptr.vmem [resolvable:$true] %s24_s25 }
   0x2   :  { %p1717_p0 = scmp.ne.s32.totalorder %s1980_s3, %s1716_s28  ;;  %p1720_p1 = scmp.lt.u32.totalorder %s1716_s28, %s1980_s3 }
   0x4   :  { %p1722_p2 = pnand %p1720_p1, %p1717_p0 }
   0x6   :  { %1725 = shalt.err (!%p1722_p2)
}
   0x7   :  { %s1726_s10 = scalar_lea.vmem %s25_s25, 12288  ;;  %p1731_p4 = scmp.lt.s32.totalorder %s25_s25, %s25_s25 }
   0x8   :  { %p1727_p3 = scmp.ne.s32.totalorder %s25_s25, %s1726_s10  ;;  %p1732_p5 = scmp.lt.s32.totalorder %s1726_s10, %s1726_s10 }
   0xa   :  { %p1733_p6 = por %p1732_p5, %p1731_p4 }
   0xc   :  { %p1734_p7 = pnand %p1733_p6, %p1727_p3 }
   0xe   :  { %1737 = shalt.err (!%p1734_p7)
}
   0xf   :  { %s1741_s11 = smov 192   ;;  %s1742_s12 = smov 12  }
  0x10   :  { %30 = dma.hbm_to_vmem [thread:$0]  %s1980_s3, 12288, %s25_s25, [#allocation3], %s1741_s11, %s1741_s11, %s1742_s12  }
  0x11   :  { %1738 = dma.done.wait [#allocation3], 12288  }
  0x12   :  { %1739 = vsyncadd [#allocation3], 4294955008  ;;  %v1743_v0 = vmov 1   ;;  %v1744_v1 = vmov 0   ;;  %v41_v2 = vld [vmem:[%s1977_s0] sm:$0xff]  ;;  %v42_v3 = vld [vmem:[%s1977_s0 + $0x8] sm:$0xff]  ;;  %v55_v54 = vlaneseq }
  0x13   :  { %1558 = vset.pattern.permute.xlu1 %v1743_v0  ;;  %1557 = vset.pattern.permute.xlu0 %v1744_v1  ;;  %v1560_v4 = vld [vmem:[#allocation2 + $0x4] ss:$12 sps:$4 sm:$0xff]   ;;  %v1562_v5 = vld [vmem:[#allocation2] ss:$12 sps:$4 sm:$0xff]   ;;  %v1563_v6 = vld [vmem:[#allocation2 + $0x1c] ss:$12 sps:$4 sm:$0xff]  }
  0x14   :  { %100 = vperm.xlu1 %1558, %v41_v2   ;;  %46 = vperm.xlu0 %1557, %v41_v2   ;;  %v1565_v7 = vld [vmem:[#allocation2 + $0x18] ss:$12 sps:$4 sm:$0xff]   ;;  %v1566_v8 = vld [vmem:[#allocation2 + $0x34] ss:$12 sps:$4 sm:$0xff]   ;;  %v1568_v9 = vld [vmem:[#allocation2 + $0x30] ss:$12 sps:$4 sm:$0xff]  }
  0x15   :  { %858 = vmatprep.subr.bf16.mxu0 %v1560_v4  ;;  %v1569_v10 = vld [vmem:[#allocation2 + $0x4c] ss:$12 sps:$4 sm:$0xff]   ;;  %v1571_v11 = vld [vmem:[#allocation2 + $0x48] ss:$12 sps:$4 sm:$0xff]   ;;  %v1572_v12 = vld [vmem:[#allocation2 + $0x64] ss:$12 sps:$4 sm:$0xff]  }
  0x16   :  { %859 = vmatpush1.bf16.msra.mxu0 %v1562_v5  ;;  %v1586_v13 = vld [vmem:[#allocation2 + $0xc8] ss:$12 sps:$4 sm:$0xff]   ;;  %v1574_v15 = vld [vmem:[#allocation2 + $0x60] ss:$12 sps:$4 sm:$0xff]   ;;  %v1577_v19 = vld [vmem:[#allocation2 + $0x78] ss:$12 sps:$4 sm:$0xff]  }
  0x17   :  { %860 = vmatprep.subr.bf16.mxu0 %v1563_v6  ;;  %v1588_v14 = vld [vmem:[#allocation2 + $0x8] ss:$12 sps:$4 sm:$0xff]   ;;  %1447 = vmatprep.subr.bf16.mxu1 %v1586_v13  ;;  %v1591_v17 = vld [vmem:[#allocation2 + $0xe0] ss:$12 sps:$4 sm:$0xff]   ;;  %v1596_v20 = vld [vmem:[#allocation2 + $0xf8] ss:$12 sps:$4 sm:$0xff]  }
  0x18   :  { %104 = vperm.xlu1 %1558, %v42_v3   ;;  %51 = vperm.xlu0 %1557, %v42_v3   ;;  %v1575_v16 = vld [vmem:[#allocation2 + $0x7c] ss:$12 sps:$4 sm:$0xff]   ;;  %v1593_v18 = vld [vmem:[#allocation2 + $0x20] ss:$12 sps:$4 sm:$0xff]   ;;  %v1598_v22 = vld [vmem:[#allocation2 + $0x38] ss:$12 sps:$4 sm:$0xff]  }
  0x19   :  { %1448 = vmatpush3.bf16.msra.mxu1 %v1588_v14  ;;  %v1578_v21 = vld [vmem:[#allocation2 + $0x94] ss:$12 sps:$4 sm:$0xff]   ;;  %v1580_v23 = vld [vmem:[#allocation2 + $0x90] ss:$12 sps:$4 sm:$0xff]   ;;  %v1581_v26 = vld [vmem:[#allocation2 + $0xac] ss:$12 sps:$4 sm:$0xff]  }
  0x1a   :  { %861 = vmatpush1.bf16.msra.mxu0 %v1565_v7  ;;  %1449 = vmatprep.subr.bf16.mxu1 %v1591_v17  ;;  %v1601_v24 = vld [vmem:[#allocation2 + $0x110] ss:$12 sps:$4 sm:$0xff]   ;;  %v1583_v27 = vld [vmem:[#allocation2 + $0xa8] ss:$12 sps:$4 sm:$0xff]   ;;  %v1611_v31 = vld [vmem:[#allocation2 + $0x140] ss:$12 sps:$4 sm:$0xff]  }
  0x1b   :  { %862 = vmatprep.subr.bf16.mxu0 %v1566_v8  ;;  %v1603_v25 = vld [vmem:[#allocation2 + $0x50] ss:$12 sps:$4 sm:$0xff]   ;;  %v1606_v28 = vld [vmem:[#allocation2 + $0x128] ss:$12 sps:$4 sm:$0xff]   ;;  %v1587_v32 = vld [vmem:[#allocation2 + $0xc0] ss:$12 sps:$4 sm:$0xff]  }
  0x1c   :  { %1559 = vset.pattern.permute.xlu0 %v1743_v0  ;;  %v1584_v29 = vld [vmem:[#allocation2 + $0xc4] ss:$12 sps:$4 sm:$0xff]   ;;  %v1608_v30 = vld [vmem:[#allocation2 + $0x68] ss:$12 sps:$4 sm:$0xff]   ;;  %v1613_v34 = vld [vmem:[#allocation2 + $0x80] ss:$12 sps:$4 sm:$0xff]  }
  0x1d   :  { %1450 = vmatpush3.bf16.msra.mxu1 %v1593_v18  ;;  %v1589_v33 = vld [vmem:[#allocation2 + $0xdc] ss:$12 sps:$4 sm:$0xff]   ;;  %v1616_v35 = vld [vmem:[#allocation2 + $0x158] ss:$12 sps:$4 sm:$0xff]   ;;  %v1594_v38 = vld [vmem:[#allocation2 + $0xf4] ss:$12 sps:$4 sm:$0xff]  }
  0x1e   :  { %863 = vmatpush1.bf16.msra.mxu0 %v1568_v9  ;;  %1451 = vmatprep.subr.bf16.mxu1 %v1596_v20  ;;  %v1592_v36 = vld [vmem:[#allocation2 + $0xd8] ss:$12 sps:$4 sm:$0xff]   ;;  %v1621_v39 = vld [vmem:[#allocation2 + $0x170] ss:$12 sps:$4 sm:$0xff]   ;;  %v1627_v43 = vld [vmem:[#allocation2 + $0x248] ss:$12 sps:$4 sm:$0xff]  }
  0x1f   :  { %864 = vmatprep.subr.bf16.mxu0 %v1569_v10  ;;  %v1618_v37 = vld [vmem:[#allocation2 + $0x98] ss:$12 sps:$4 sm:$0xff]   ;;  %v1597_v40 = vld [vmem:[#allocation2 + $0xf0] ss:$12 sps:$4 sm:$0xff]   ;;  %v1602_v44 = vld [vmem:[#allocation2 + $0x108] ss:$12 sps:$4 sm:$0xff]  }
  0x20   :  { %v1599_v41 = vld [vmem:[#allocation2 + $0x10c] ss:$12 sps:$4 sm:$0xff]   ;;  %v1623_v42 = vld [vmem:[#allocation2 + $0xb0] ss:$12 sps:$4 sm:$0xff]   ;;  %v1614_v49 = vld [vmem:[#allocation2 + $0x154] ss:$12 sps:$4 sm:$0xff]  }
  0x21   :  { %1452 = vmatpush3.bf16.msra.mxu1 %v1598_v22  ;;  %v1604_v45 = vld [vmem:[#allocation2 + $0x124] ss:$12 sps:$4 sm:$0xff]   ;;  %v1607_v46 = vld [vmem:[#allocation2 + $0x120] ss:$12 sps:$4 sm:$0xff]   ;;  %v1609_v47 = vld [vmem:[#allocation2 + $0x13c] ss:$12 sps:$4 sm:$0xff]  }
  0x22   :  { %865 = vmatpush1.bf16.msra.mxu0 %v1571_v11  ;;  %1453 = vmatprep.subr.bf16.mxu1 %v1601_v24  ;;  %v1612_v48 = vld [vmem:[#allocation2 + $0x138] ss:$12 sps:$4 sm:$0xff]   ;;  %v1617_v50 = vld [vmem:[#allocation2 + $0x150] ss:$12 sps:$4 sm:$0xff]   ;;  %v1622_v52 = vld [vmem:[#allocation2 + $0x168] ss:$12 sps:$4 sm:$0xff]  }
  0x23   :  { %866 = vmatprep.subr.bf16.mxu0 %v1572_v12  ;;  %v1619_v51 = vld [vmem:[#allocation2 + $0x16c] ss:$12 sps:$4 sm:$0xff]   ;;  %v1626_v53 = vld [vmem:[#allocation2 + $0x184] ss:$12 sps:$4 sm:$0xff]   ;;  %v1805_v55 = vshrl.u32 %v55_v54, 7  ;;  %vm1746_vm0 = vmmov 0  }
  0x24   :  { %v1814_v58 = vld [vmem:[%s1978_s1] sm:$0xff]  ;;  %vm1318_vm1 = vcmask 64512  }
  0x25   :  { %1454 = vmatpush3.bf16.msra.mxu1 %v1603_v25  ;;  %v1808_v56 = vsub.s32 1, %v1805_v55  ;;  %v113_v57 = vsub.s32 3, %v1805_v55  ;;  %v1817_v59 = vsub.s32 0, %v1805_v55  ;;  %v1820_v60 = vsub.s32 2, %v1805_v55  ;;  %v1846_v13 = vld [vmem:[%s1979_s2] sm:$0xf] }
  0x26   :  { %867 = vmatpush1.bf16.msra.mxu0 %v1574_v15  ;;  %1455 = vmatprep.subr.bf16.mxu1 %v1606_v28  ;;  %v121_v61 = vsub.s32 7, %v1805_v55  ;;  %v69_v62 = vsub.s32 6, %v1805_v55  ;;  %v1632_v54 = vld [vmem:[#allocation2 + $0x260] ss:$12 sps:$4 sm:$0xff]  }
  0x27   :  { %868 = vmatprep.subr.bf16.mxu0 %v1575_v16  ;;  %v110_v63 = vrot.slane %v1814_v58, %v1808_v56  ;;  %v114_v0 = vrot.slane %v1814_v58, %v113_v57  ;;  %v58_v1 = vrot.slane %v1814_v58, %v1817_v59  ;;  %v62_v2 = vrot.slane %v1814_v58, %v1820_v60 }
  0x28   :  { %v122_v3 = vrot.slane %v1814_v58, %v121_v61  ;;  %v70_v4 = vrot.slane %v1814_v58, %v69_v62  ;;  %v168_v20 = vrot.slane %v1846_v13, %v1808_v56  ;;  %v164_v25 = vrot.slane %v1846_v13, %v1817_v59  ;;  %v1629_v61 = vld [vmem:[#allocation2 + $0x198] ss:$12 sps:$4 sm:$0xff]   ;;  %v1633_v62 = vld [vmem:[#allocation2 + $0x1a0] ss:$12 sps:$4 sm:$0xff]  }
  0x29   :  { %1456 = vmatpush3.bf16.msra.mxu1 %v1608_v30  ;;  %v130_v5 = vrot.slane %v110_v63, %v1808_v56  ;;  %v134_v6 = vrot.slane %v114_v0, %v1808_v56  ;;  %v78_v7 = vrot.slane %v58_v1, %v1817_v59  ;;  %v82_v8 = vrot.slane %v62_v2, %v1817_v59  ;;  %v1636_v63 = vld [vmem:[#allocation2 + $0x1b4] ss:$12 sps:$4 sm:$0xff]   ;;  %v1637_v0 = vld [vmem:[#allocation2 + $0x278] ss:$12 sps:$4 sm:$0xff]  }
  0x2a   :  { %869 = vmatpush1.bf16.msra.mxu0 %v1577_v19  ;;  %1457 = vmatprep.subr.bf16.mxu1 %v1611_v31  ;;  %v142_v9 = vrot.slane %v122_v3, %v1808_v56  ;;  %v90_v10 = vrot.slane %v70_v4, %v1817_v59  ;;  %v117_v1 = vsub.s32 5, %v1805_v55  ;;  %v65_v2 = vsub.s32 4, %v1805_v55  ;;  %v1634_v3 = vld [vmem:[#allocation2 + $0x1b0] ss:$12 sps:$4 sm:$0xff]   ;;  %v1638_v4 = vld [vmem:[#allocation2 + $0x1b8] ss:$12 sps:$4 sm:$0xff]  }
  0x2b   :  { %870 = vmatprep.subr.bf16.mxu0 %v1578_v21  ;;  %v1647_v55 = vld [vmem:[#allocation2 + $0x2a8] ss:$12 sps:$4 sm:$0xff]  }
  0x2d   :  { %1458 = vmatpush3.bf16.msra.mxu1 %v1613_v34  ;;  %v176_v34 = vrot.slane %v1846_v13, %v113_v57 }
  0x2e   :  { %871 = vmatpush1.bf16.msra.mxu0 %v1580_v23  ;;  %1459 = vmatprep.subr.bf16.mxu1 %v1616_v35 }
  0x2f   :  { %872 = vmatprep.subr.bf16.mxu0 %v1581_v26 }
  0x31   :  { %1460 = vmatpush3.bf16.msra.mxu1 %v1618_v37 }
  0x32   :  { %873 = vmatpush1.bf16.msra.mxu0 %v1583_v27  ;;  %1461 = vmatprep.subr.bf16.mxu1 %v1621_v39 }
  0x33   :  { %874 = vmatprep.subr.bf16.mxu0 %v1584_v29 }
  0x35   :  { %1462 = vmatpush3.bf16.msra.mxu1 %v1623_v42 }
  0x36   :  { %875 = vmatpush1.bf16.msra.mxu0 %v1587_v32  ;;  %1469 = vmatprep.subr.bf16.mxu1 %v1627_v43 }
  0x37   :  { %876 = vmatprep.subr.bf16.mxu0 %v1589_v33 }
  0x3a   :  { %877 = vmatpush1.bf16.msra.mxu0 %v1592_v36 }
  0x3b   :  { %878 = vmatprep.subr.bf16.mxu0 %v1594_v38 }
  0x3e   :  { %879 = vmatpush1.bf16.msra.mxu0 %v1597_v40 }
  0x3f   :  { %880 = vmatprep.subr.bf16.mxu0 %v1599_v41 }
  0x42   :  { %881 = vmatpush1.bf16.msra.mxu0 %v1602_v44 }
  0x43   :  { %882 = vmatprep.subr.bf16.mxu0 %v1604_v45 }
  0x46   :  { %883 = vmatpush1.bf16.msra.mxu0 %v1607_v46 }
  0x47   :  { %884 = vmatprep.subr.bf16.mxu0 %v1609_v47 }
  0x4a   :  { %885 = vmatpush1.bf16.msra.mxu0 %v1612_v48 }
  0x4b   :  { %886 = vmatprep.subr.bf16.mxu0 %v1614_v49  ;;  %v1624_v49 = vld [vmem:[#allocation2 + $0x180] ss:$12 sps:$4 sm:$0xff]  }
  0x4e   :  { %887 = vmatpush1.bf16.msra.mxu0 %v1617_v50 }
  0x4f   :  { %888 = vmatprep.subr.bf16.mxu0 %v1619_v51  ;;  %v1628_v51 = vld [vmem:[#allocation2 + $0x188] ss:$12 sps:$4 sm:$0xff]  }
  0x52   :  { %889 = vmatpush1.bf16.msra.mxu0 %v1622_v52 }
  0x53   :  { %901 = vmatprep.subr.bf16.mxu0 %v1626_v53  ;;  %v1631_v53 = vld [vmem:[#allocation2 + $0x19c] ss:$12 sps:$4 sm:$0xff]  }
  0x93   :  { %v1839_v11 = vpop.permute.xlu1 %100  ;;  %v1841_v12 = vpop.permute.xlu0 %46 }
  0x94   :  { %v143_v14 = vmul.f32 %v130_v5, %v1839_v11  ;;  %v144_v15 = vmul.f32 %v134_v6, %v1839_v11  ;;  %v91_v16 = vmul.f32 %v78_v7, %v1841_v12  ;;  %v92_v17 = vmul.f32 %v82_v8, %v1841_v12 }
  0x95   :  { %v146_v18 = vmul.f32 %v142_v9, %v1839_v11  ;;  %v94_v19 = vmul.f32 %v90_v10, %v1841_v12 }
  0x96   :  { %v152_v23 = vadd.f32 %v144_v15, %v92_v17  ;;  %v151_v24 = vadd.f32 %v143_v14, %v91_v16  ;;  %v1646_v14 = vld [vmem:[#allocation2 + $0x1e4] ss:$12 sps:$4 sm:$0xff]   ;;  %v1644_v17 = vld [vmem:[#allocation2 + $0x1e0] ss:$12 sps:$4 sm:$0xff]  }
  0x97   :  { %v1856_v21 = vpop.permute.xlu1 %104  ;;  %v1858_v22 = vpop.permute.xlu0 %51  ;;  %v154_v33 = vadd.f32 %v146_v18, %v94_v19  ;;  %v1648_v18 = vld [vmem:[#allocation2 + $0x1e8] ss:$12 sps:$4 sm:$0xff]  }
  0x98   :  { %v147_v26 = vmul.f32 %v130_v5, %v1856_v21  ;;  %v148_v27 = vmul.f32 %v134_v6, %v1856_v21  ;;  %v150_v28 = vmul.f32 %v142_v9, %v1856_v21  ;;  %v95_v29 = vmul.f32 %v78_v7, %v1858_v22  ;;  %v1641_v5 = vld [vmem:[#allocation2 + $0x1cc] ss:$12 sps:$4 sm:$0xff]   ;;  %v1642_v6 = vld [vmem:[#allocation2 + $0x290] ss:$12 sps:$4 sm:$0xff]   ;;  %v1639_v9 = vld [vmem:[#allocation2 + $0x1c8] ss:$12 sps:$4 sm:$0xff]  }
  0x99   :  { %v96_v30 = vmul.f32 %v82_v8, %v1858_v22  ;;  %v98_v31 = vmul.f32 %v90_v10, %v1858_v22  ;;  %v182_v32 = vadd.f32 %v168_v20, %v152_v23  ;;  %v181_v38 = vadd.f32 %v164_v25, %v151_v24  ;;  %v1643_v10 = vld [vmem:[#allocation2 + $0x1d0] ss:$12 sps:$4 sm:$0xff]   ;;  %v1652_v23 = vld [vmem:[#allocation2 + $0x2c0] ss:$12 sps:$4 sm:$0xff]  }
  0x9a   :  { %v155_v35 = vadd.f32 %v147_v26, %v95_v29  ;;  %v184_v42 = vadd.f32 %v176_v34, %v154_v33  ;;  %v118_v7 = vrot.slane %v1814_v58, %v117_v1  ;;  %v66_v8 = vrot.slane %v1814_v58, %v65_v2  ;;  %v1649_v26 = vld [vmem:[#allocation2 + $0x1f8] ss:$12 sps:$4 sm:$0xff]   ;;  %v1656_v29 = vld [vmem:[#allocation2 + $0x214] ss:$12 sps:$4 sm:$0xff]   ;;  %v1662_v33 = vld [vmem:[#allocation2 + $0x2f0] ss:$12 sps:$4 sm:$0xff]  }
  0x9b   :  { %v156_v36 = vadd.f32 %v148_v27, %v96_v30  ;;  %v158_v37 = vadd.f32 %v150_v28, %v98_v31  ;;  %v190_v43 = vmax.f32 %v182_v32, 0.0  ;;  %v189_v45 = vmax.f32 %v181_v38, 0.0  ;;  %v1653_v27 = vld [vmem:[#allocation2 + $0x200] ss:$12 sps:$4 sm:$0xff]   ;;  %v1657_v30 = vld [vmem:[#allocation2 + $0x2d8] ss:$12 sps:$4 sm:$0xff]  }
  0x9c   :  { %v185_v40 = vadd.f32 %v164_v25, %v155_v35  ;;  %v192_v52 = vmax.f32 %v184_v42, 0.0  ;;  %v138_v15 = vrot.slane %v118_v7, %v1808_v56  ;;  %v86_v16 = vrot.slane %v66_v8, %v1817_v59  ;;  %v1654_v31 = vld [vmem:[#allocation2 + $0x210] ss:$12 sps:$4 sm:$0xff]   ;;  %v1658_v32 = vld [vmem:[#allocation2 + $0x218] ss:$12 sps:$4 sm:$0xff]   ;;  %v1699_v7 = vld [vmem:[%s1982_s5 + $0x28] sm:$0xff]  }
  0x9d   :  { %v186_v39 = vadd.f32 %v168_v20, %v156_v36  ;;  %v188_v41 = vadd.f32 %v176_v34, %v158_v37  ;;  %v1651_v20 = vld [vmem:[#allocation2 + $0x1fc] ss:$12 sps:$4 sm:$0xff]   ;;  %v1666_v38 = vld [vmem:[#allocation2 + $0x244] ss:$12 sps:$4 sm:$0xff]  }
  0x9e   :  { %v193_v46 = vmax.f32 %v185_v40, 0.0  ;;  %v149_v19 = vmul.f32 %v138_v15, %v1856_v21  ;;  %v97_v58 = vmul.f32 %v86_v16, %v1858_v22  ;;  %v145_v24 = vmul.f32 %v138_v15, %v1839_v11  ;;  %v1659_v35 = vld [vmem:[#allocation2 + $0x228] ss:$12 sps:$4 sm:$0xff]   ;;  %v1663_v36 = vld [vmem:[#allocation2 + $0x230] ss:$12 sps:$4 sm:$0xff]  }
  0x9f   :  { %v194_v44 = vmax.f32 %v186_v39, 0.0  ;;  %v196_v47 = vmax.f32 %v188_v41, 0.0  ;;  %v93_v25 = vmul.f32 %v86_v16, %v1841_v12  ;;  %v172_v22 = vrot.slane %v1846_v13, %v1820_v60  ;;  %v1661_v12 = vld [vmem:[#allocation2 + $0x22c] ss:$12 sps:$4 sm:$0xff]   ;;  %v1669_v41 = vld [vmem:[#allocation2 + $0x25c] ss:$12 sps:$4 sm:$0xff]  }
  0xa0   :  { %v197_v50 = vpack.c.bf16 %v193_v46, %v189_v45  ;;  %v157_v28 = vadd.f32 %v149_v19, %v97_v58  ;;  %v1664_v13 = vld [vmem:[#allocation2 + $0x240] ss:$12 sps:$4 sm:$0xff]   ;;  %v1667_v42 = vld [vmem:[#allocation2 + $0x258] ss:$12 sps:$4 sm:$0xff]   ;;  %v1673_v46 = vld [vmem:[#allocation2 + $0x288] ss:$12 sps:$4 sm:$0xff]  }
  0xa1   :  { %v198_v48 = vpack.c.bf16 %v194_v44, %v190_v43  ;;  %v200_v57 = vpack.c.bf16 %v196_v47, %v192_v52  ;;  %v153_v21 = vadd.f32 %v145_v24, %v93_v25  ;;  %v1672_v43 = vld [vmem:[#allocation2 + $0x274] ss:$12 sps:$4 sm:$0xff]   ;;  %v1670_v44 = vld [vmem:[#allocation2 + $0x270] ss:$12 sps:$4 sm:$0xff]   ;;  %v1675_v45 = vld [vmem:[#allocation2 + $0x28c] ss:$12 sps:$4 sm:$0xff]  }
  0xa2   :  { %v187_v11 = vadd.f32 %v172_v22, %v157_v28  ;;  %v1678_v47 = vld [vmem:[#allocation2 + $0x2a4] ss:$12 sps:$4 sm:$0xff]   ;;  %v1694_v2 = vld [vmem:[%s1982_s5 + $0x58] sm:$0xff]  }
  0xa3   :  { %890 = vmatprep.mubr.bf16.mxu0 %v198_v48  ;;  %976 = vmatprep.mubr.bf16.mxu1 %v198_v48  ;;  %v183_v34 = vadd.f32 %v172_v22, %v153_v21  ;;  %v1676_v48 = vld [vmem:[#allocation2 + $0x2a0] ss:$12 sps:$4 sm:$0xff]   ;;  %v1682_v52 = vld [vmem:[#allocation2 + $0x2d0] ss:$12 sps:$4 sm:$0xff]  }
  0xa4   :  { %891 = vmatmul.mubr.bf16.vlgmr.msra.gmra.mrb[0].mxu0 %v197_v50  ;;  %977 = vmatmul.mubr.bf16.vlgmr.msra.gmra.mrb[0].mxu1 %v197_v50  ;;  %v195_v37 = vmax.f32 %v187_v11, 0.0  ;;  %v1679_v50 = vld [vmem:[#allocation2 + $0x2b8] ss:$12 sps:$4 sm:$0xff]   ;;  %v1693_v1 = vld [vmem:[%s1982_s5 + $0x10] sm:$0xff]  }
  0xa5   :  { %902 = vmatpush1.bf16.msra.mxu0 %v1624_v49  ;;  %1470 = vmatpush3.bf16.msra.mxu1 %v1628_v51  ;;  %v191_v39 = vmax.f32 %v183_v34, 0.0  ;;  %v1681_v49 = vld [vmem:[#allocation2 + $0x2bc] ss:$12 sps:$4 sm:$0xff]   ;;  %v1684_v51 = vld [vmem:[#allocation2 + $0x2d4] ss:$12 sps:$4 sm:$0xff]  }
  0xa6   :  { %933 = vmatprep.mubr.bf16.mxu0 %v200_v57  ;;  %1017 = vmatprep.mubr.bf16.mxu1 %v200_v57  ;;  %v1688_v57 = vld [vmem:[%s1982_s5 + $0x40] sm:$0xff]   ;;  %v1700_v8 = vld [vmem:[%s1982_s5 + $0x70] sm:$0xff]  }
  0xa7   :  { %903 = vmatprep.subr.bf16.mxu0 %v1631_v53  ;;  %1471 = vmatprep.subr.bf16.mxu1 %v1632_v54  ;;  %v199_v40 = vpack.c.bf16 %v195_v37, %v191_v39  ;;  %v1687_v53 = vld [vmem:[#allocation2 + $0x2ec] ss:$12 sps:$4 sm:$0xff]   ;;  %v1685_v54 = vld [vmem:[#allocation2 + $0x2e8] ss:$12 sps:$4 sm:$0xff]  }
  0xa9   :  { %904 = vmatpush1.bf16.msra.mxu0 %v1629_v61  ;;  %1472 = vmatpush3.bf16.msra.mxu1 %v1633_v62  ;;  %v1689_v61 = vld [vmem:[%s1982_s5] sm:$0xff]   ;;  %v1690_v62 = vld [vmem:[%s1982_s5 + $0x48] sm:$0xff]  }
  0xaa   :  { %905 = vmatprep.subr.bf16.mxu0 %v1636_v63  ;;  %1473 = vmatprep.subr.bf16.mxu1 %v1637_v0  ;;  %v1691_v63 = vld [vmem:[%s1982_s5 + $0x8] sm:$0xff]   ;;  %v1692_v0 = vld [vmem:[%s1982_s5 + $0x50] sm:$0xff]  }
  0xad   :  { %906 = vmatpush1.bf16.msra.mxu0 %v1634_v3  ;;  %1474 = vmatpush3.bf16.msra.mxu1 %v1638_v4  ;;  %v1695_v3 = vld [vmem:[%s1982_s5 + $0x18] sm:$0xff]   ;;  %v1696_v4 = vld [vmem:[%s1982_s5 + $0x60] sm:$0xff]  }
  0xae   :  { %907 = vmatprep.subr.bf16.mxu0 %v1641_v5  ;;  %1475 = vmatprep.subr.bf16.mxu1 %v1642_v6  ;;  %v1697_v5 = vld [vmem:[%s1982_s5 + $0x20] sm:$0xff]   ;;  %v1698_v6 = vld [vmem:[%s1982_s5 + $0x68] sm:$0xff]  }
  0xb1   :  { %908 = vmatpush1.bf16.msra.mxu0 %v1639_v9  ;;  %1476 = vmatpush3.bf16.msra.mxu1 %v1643_v10  ;;  %v1701_v9 = vld [vmem:[%s1982_s5 + $0x30] sm:$0xff]   ;;  %v1702_v10 = vld [vmem:[%s1982_s5 + $0x78] sm:$0xff]  }
  0xb2   :  { %909 = vmatprep.subr.bf16.mxu0 %v1646_v14  ;;  %1477 = vmatprep.subr.bf16.mxu1 %v1647_v55  ;;  %v1703_v14 = vld [vmem:[%s1982_s5 + $0x38] sm:$0xff]   ;;  %v1745_v55 = vmov 0.0  }
  0xb5   :  { %910 = vmatpush1.bf16.msra.mxu0 %v1644_v17  ;;  %1478 = vmatpush3.bf16.msra.mxu1 %v1648_v18 }
  0xb6   :  { %911 = vmatprep.subr.bf16.mxu0 %v1651_v20  ;;  %1479 = vmatprep.subr.bf16.mxu1 %v1652_v23  ;;  %v329_v20 = vld [vmem:[%s1981_s4] sm:$0x7] }
  0xb7   :  { %v342_v23 = vrot.slane %v329_v20, %v1820_v60  ;;  %v338_v34 = vrot.slane %v329_v20, %v1808_v56  ;;  %v1705_v56 = vld [vmem:[%s1982_s5 + $0x88] sm:$0xff]  }
  0xb9   :  { %912 = vmatpush1.bf16.msra.mxu0 %v1649_v26  ;;  %1480 = vmatpush3.bf16.msra.mxu1 %v1653_v27 }
  0xba   :  { %913 = vmatprep.subr.bf16.mxu0 %v1656_v29  ;;  %1481 = vmatprep.subr.bf16.mxu1 %v1657_v30 }
  0xbd   :  { %914 = vmatpush1.bf16.msra.mxu0 %v1654_v31  ;;  %1482 = vmatpush3.bf16.msra.mxu1 %v1658_v32 }
  0xbe   :  { %915 = vmatprep.subr.bf16.mxu0 %v1661_v12  ;;  %1483 = vmatprep.subr.bf16.mxu1 %v1662_v33  ;;  %v334_v33 = vrot.slane %v329_v20, %v1817_v59  ;;  %v1704_v59 = vld [vmem:[%s1982_s5 + $0x80] sm:$0xff]  }
  0xc1   :  { %916 = vmatpush1.bf16.msra.mxu0 %v1659_v35  ;;  %1484 = vmatpush3.bf16.msra.mxu1 %v1663_v36 }
  0xc2   :  { %917 = vmatprep.subr.bf16.mxu0 %v1666_v38  ;;  %1491 = vmatprep.subr.bf16.mxu1 %v1688_v57 }
  0xc4   :  { %1018 = vmatmul.mubr.bf16.vlgmr.msra.gmra.mrb[4].mxu1 %v199_v40 }
  0xc5   :  { %918 = vmatpush1.bf16.msra.mxu0 %v1664_v13  ;;  %1492 = vmatpush3.bf16.msra.mxu1 %v1689_v61 }
  0xc6   :  { %919 = vmatprep.subr.bf16.mxu0 %v1669_v41  ;;  %1493 = vmatprep.subr.bf16.mxu1 %v1690_v62 }
  0xc9   :  { %920 = vmatpush1.bf16.msra.mxu0 %v1667_v42  ;;  %1494 = vmatpush3.bf16.msra.mxu1 %v1691_v63 }
  0xca   :  { %921 = vmatprep.subr.bf16.mxu0 %v1672_v43  ;;  %1495 = vmatprep.subr.bf16.mxu1 %v1692_v0  ;;  %v1422_v0 = vld [vmem:[%s1983_s6] ss:$0 sm:$0xff] }
  0xcd   :  { %922 = vmatpush1.bf16.msra.mxu0 %v1670_v44  ;;  %1496 = vmatpush3.bf16.msra.mxu1 %v1693_v1 }
  0xce   :  { %923 = vmatprep.subr.bf16.mxu0 %v1675_v45  ;;  %1497 = vmatprep.subr.bf16.mxu1 %v1694_v2 }
  0xd1   :  { %924 = vmatpush1.bf16.msra.mxu0 %v1673_v46  ;;  %1498 = vmatpush3.bf16.msra.mxu1 %v1695_v3 }
  0xd2   :  { %925 = vmatprep.subr.bf16.mxu0 %v1678_v47  ;;  %1499 = vmatprep.subr.bf16.mxu1 %v1696_v4  ;;  %v1706_v47 = vld [vmem:[%s1982_s5 + $0x90] sm:$0xff]  }
  0xd5   :  { %926 = vmatpush1.bf16.msra.mxu0 %v1676_v48  ;;  %1500 = vmatpush3.bf16.msra.mxu1 %v1697_v5  ;;  %v1707_v48 = vld [vmem:[%s1982_s5 + $0x98] sm:$0xff]  }
  0xd6   :  { %927 = vmatprep.subr.bf16.mxu0 %v1681_v49  ;;  %1501 = vmatprep.subr.bf16.mxu1 %v1698_v6  ;;  %v1708_v49 = vld [vmem:[%s1982_s5 + $0xa0] sm:$0xff]  }
  0xd9   :  { %928 = vmatpush1.bf16.msra.mxu0 %v1679_v50  ;;  %1502 = vmatpush3.bf16.msra.mxu1 %v1699_v7  ;;  %v1709_v50 = vld [vmem:[%s1982_s5 + $0xa8] sm:$0xff]  }
  0xda   :  { %929 = vmatprep.subr.bf16.mxu0 %v1684_v51  ;;  %1503 = vmatprep.subr.bf16.mxu1 %v1700_v8  ;;  %v1710_v51 = vld [vmem:[%s1982_s5 + $0xb0] sm:$0xff]  }
  0xdd   :  { %930 = vmatpush1.bf16.msra.mxu0 %v1682_v52  ;;  %1504 = vmatpush3.bf16.msra.mxu1 %v1701_v9  ;;  %v1711_v52 = vld [vmem:[%s1982_s5 + $0xb8] sm:$0xff]  }
  0xde   :  { %931 = vmatprep.subr.bf16.mxu0 %v1687_v53  ;;  %1505 = vmatprep.subr.bf16.mxu1 %v1702_v10 }
  0xe1   :  { %932 = vmatpush1.bf16.msra.mxu0 %v1685_v54  ;;  %1506 = vmatpush3.bf16.msra.mxu1 %v1703_v14 }
  0xe2   :  { %1522 = vmatprep.subr.bf16.mxu1 %v1745_v55 }
  0xe4   :  { %934 = vmatmul.mubr.bf16.vlgmr.msra.gmra.mrb[0].mxu0 %v199_v40 }
 0x177   :  { %v1463_v15 = vpop.f32.mrb[0].mxu1 }
 0x178   :  { %v1464_v16 = vpop.f32.mrb[1].mxu1 }
 0x179   :  { %v1465_v17 = vadd.f32 %v1464_v16, %v1463_v15  ;;  %v1466_v18 = vpop.f32.mrb[2].mxu1 }
 0x17a   :  { %v1467_v19 = vpop.f32.mrb[3].mxu1 }
 0x17b   :  { %v1468_v58 = vadd.f32 %v1467_v19, %v1466_v18  ;;  %v979_v26 = vadd.f32 %v1465_v17, %v342_v23 }
 0x17d   :  { %v982_v30 = vadd.f32 %v1468_v58, %v342_v23 }
 0x197   :  { %v1485_v24 = vpop.f32.mrb[4].mxu1 }
 0x198   :  { %v1486_v25 = vpop.f32.mrb[5].mxu1 }
 0x199   :  { %v1487_v27 = vadd.f32 %v1486_v25, %v1485_v24  ;;  %v1488_v28 = vpop.f32.mrb[6].mxu1 }
 0x19a   :  { %v1489_v29 = vpop.f32.mrb[7].mxu1 }
 0x19b   :  { %v1020_v21 = vadd.f32 %v1487_v27, %v979_v26  ;;  %v1490_v22 = vadd.f32 %v1489_v29, %v1488_v28 }
 0x19d   :  { %v1023_v31 = vadd.f32 %v1490_v22, %v982_v30  ;;  %v1028_v32 = vmax.f32 %v1020_v21, 0.0 }
 0x19f   :  { %v1031_v11 = vmax.f32 %v1023_v31, 0.0 }
 0x1a1   :  { %v1034_v12 = vpack.c.bf16 %v1031_v11, %v1028_v32 }
 0x1b7   :  { %v935_v35 = vpop.f32.mrb[0].mxu0 }
 0x1b8   :  { %v1542_v36 = vadd.f32 %v935_v35, %v334_v33  ;;  %v937_v60 = vpop.f32.mrb[1].mxu0 }
 0x1b9   :  { %v1543_v37 = vadd.f32 %v937_v60, %v338_v34  ;;  %v939_v38 = vpop.f32.mrb[2].mxu0 }
 0x1ba   :  { %v1544_v39 = vadd.f32 %v939_v38, %v334_v33  ;;  %v941_v13 = vpop.f32.mrb[3].mxu0  ;;  %v1026_v41 = vmax.f32 %v1542_v36, 0.0 }
 0x1bb   :  { %v1545_v40 = vadd.f32 %v941_v13, %v338_v34  ;;  %v1027_v43 = vmax.f32 %v1543_v37, 0.0 }
 0x1bc   :  { %v1029_v42 = vmax.f32 %v1544_v39, 0.0 }
 0x1bd   :  { %v1030_v44 = vmax.f32 %v1545_v40, 0.0 }
 0x1be   :  { %v1032_v45 = vpack.c.bf16 %v1029_v42, %v1026_v41 }
 0x1bf   :  { %v1033_v46 = vpack.c.bf16 %v1030_v44, %v1027_v43 }
 0x1c1   :  { %1266 = vmatprep.mubr.bf16.mxu1 %v1033_v46 }
 0x1c2   :  { %1267 = vmatmul.mubr.bf16.vlgmr.msra.gmra.mrb[8].mxu1 %v1032_v45 }
 0x1c3   :  { %1523 = vmatpush3.bf16.msra.mxu1 %v1704_v59  ;;  %1538 = vmatprep.mubr.msk.bf16.mxu1 %vm1746_vm0, %v1745_v55 }
 0x1c4   :  { %1524 = vmatprep.subr.bf16.mxu1 %v1745_v55 }
 0x1c7   :  { %1525 = vmatpush3.bf16.msra.mxu1 %v1705_v56 }
 0x1c8   :  { %1526 = vmatprep.subr.bf16.mxu1 %v1745_v55 }
 0x1cb   :  { %1527 = vmatpush3.bf16.msra.mxu1 %v1706_v47 }
 0x1cc   :  { %1528 = vmatprep.subr.bf16.mxu1 %v1745_v55 }
 0x1cf   :  { %1529 = vmatpush3.bf16.msra.mxu1 %v1707_v48 }
 0x1d0   :  { %1530 = vmatprep.subr.bf16.mxu1 %v1745_v55 }
 0x1d3   :  { %1531 = vmatpush3.bf16.msra.mxu1 %v1708_v49 }
 0x1d4   :  { %1532 = vmatprep.subr.bf16.mxu1 %v1745_v55 }
 0x1d7   :  { %1533 = vmatpush3.bf16.msra.mxu1 %v1709_v50 }
 0x1d8   :  { %1534 = vmatprep.subr.bf16.mxu1 %v1745_v55 }
 0x1db   :  { %1535 = vmatpush3.bf16.msra.mxu1 %v1710_v51 }
 0x1dc   :  { %1536 = vmatprep.subr.bf16.mxu1 %v1745_v55 }
 0x1df   :  { %1537 = vmatpush3.bf16.msra.mxu1 %v1711_v52 }
 0x1e2   :  { %1539 = vmatmul.mubr.bf16.vlgmr.msra.gmra.mrb[12].mxu1 %v1034_v12 }
 0x295   :  { %v1507_v53 = vpop.f32.mrb[8].mxu1 }
 0x296   :  { %v1508_v54 = vpop.f32.mrb[9].mxu1 }
 0x297   :  { %v1509_v57 = vadd.f32 %v1508_v54, %v1507_v53  ;;  %v1510_v61 = vpop.f32.mrb[10].mxu1 }
 0x298   :  { %v1511_v62 = vpop.f32.mrb[11].mxu1 }
 0x299   :  { %v1512_v63 = vadd.f32 %v1511_v62, %v1510_v61  ;;  %v1269_v1 = vadd.f32 %v1509_v57, %v1422_v0 }
 0x29b   :  { %v1272_v5 = vadd.f32 %v1512_v63, %v1422_v0 }
 0x2b5   :  { %v1309_v2 = vpop.f32.mrb[12].mxu1 }
 0x2b6   :  { %v1310_v3 = vadd.f32 %v1309_v2, %v1269_v1  ;;  %v1540_v4 = vpop.f32.mrb[13].mxu1 }
 0x2b7   :  { %v1312_v6 = vpop.f32.mrb[14].mxu1 }
 0x2b8   :  { %1712 = vtanh.f32 %v1310_v3  ;;  %v1313_v7 = vadd.f32 %v1312_v6, %v1272_v5  ;;  %v1541_v8 = vpop.f32.mrb[15].mxu1 }
 0x2ba   :  { %1714 = vtanh.f32 %v1313_v7 }
 0x2c2   :  { %v1713_v9 = vpop.eup %1712 }
 0x2c3   :  { %1319 = vst.msk [vmem:[%s1984_s7] sm:$0xff] %vm1318_vm1, %v1713_v9 }
 0x2c4   :  { %v1715_v10 = vpop.eup %1714 }
 0x2c5   :  { %1320 = vst.msk [vmem:[%s1984_s7 + $0x8] sm:$0xff] %vm1318_vm1, %v1715_v10 }
 0x2c6   :  { %1325 = vsyncpa [#allocation3], 1 }

</bundles_post_ra>
